<compile_context>
chip_gen: v7x
topology: tpu7x:2x2x1
jax: 0.10.0
libtpu: 0.0.40
codegen_flags: <defaults>
</compile_context>

<pallas_src>
import functools

import jax
import jax.numpy as jnp
from jax.experimental import pallas as pl
from jax.experimental.pallas import tpu as pltpu


def actor_kernel(x_ref, w1_ref, b1_ref, w2_ref, b2_ref, wh_ref, bh_ref,
                 mu_ref, sigma_ref):
    n_act = mu_ref.shape[1]
    x = x_ref[...]
    # layer1 + ReLU (fp32 accumulate, fp32 bias/ReLU)
    h1 = jnp.dot(x, w1_ref[...], preferred_element_type=jnp.float32) + b1_ref[...]
    h1 = jnp.maximum(h1, 0.0).astype(w2_ref.dtype)
    # layer2 + ReLU
    h2 = jnp.dot(h1, w2_ref[...], preferred_element_type=jnp.float32) + b2_ref[...]
    h2 = jnp.maximum(h2, 0.0).astype(wh_ref.dtype)
    # fused heads: ONE MXU pass produces [bt, 2*n_actions] = [mu | sigma]
    head = jnp.dot(h2, wh_ref[...], preferred_element_type=jnp.float32) + bh_ref[...]
    mu_ref[...] = head[:, :n_act].astype(mu_ref.dtype)
    sigma_ref[...] = head[:, n_act:2 * n_act].astype(sigma_ref.dtype)


def prepare_params(params, matmul_dtype=jnp.float32):
    """One-time parameter prep (hoisted out of the per-call path): fuse the mu/sigma
    head weights/biases and cast the matmul weights.  Biases stay fp32 (they are added
    after the fp32 accumulation inside the kernel).  matmul_dtype=bf16 is recommended
    on v6e/v7x; fp32 matches PyTorch numerics exactly."""
    wh = jnp.concatenate([params["wmu"], params["wsig"]], axis=1)
    bh = jnp.concatenate([params["bmu"], params["bsig"]], axis=1)
    return dict(
        w1=params["w1"].astype(matmul_dtype),
        b1=params["b1"].astype(jnp.float32),
        w2=params["w2"].astype(matmul_dtype),
        b2=params["b2"].astype(jnp.float32),
        wh=wh.astype(matmul_dtype),
        bh=bh.astype(jnp.float32),
    )


def _round_up(n, m):
    return ((n + m - 1) // m) * m


@functools.partial(jax.jit, static_argnames=("batch_tile",))
def actor_forward(x, prep, *, batch_tile=1024):
    """x: [B, state_dim] float32.  prep: output of prepare_params().  Returns (mu, sigma)."""
    B, state_dim = x.shape
    head_width = prep["bh"].shape[1]
    n_actions = head_width // 2
    mm_dtype = prep["w1"].dtype

    # bf16 matmul inputs pack sublanes as [16,128]; keep the batch tile pack-aligned.
    sublane = 16 if jnp.dtype(mm_dtype).itemsize == 2 else 8

    # Big tiles (few grid steps) amortize per-step overhead; keeping num_tiles >= 2 for
    # non-tiny batches lets the "parallel" grid axis shard across both v7x TensorCores.
    bt = min(batch_tile, _round_up(pl.cdiv(B, 2), sublane))
    bt = max(bt, sublane)
    B_pad = _round_up(B, bt)
    if B_pad != B:
        x = jnp.pad(x, ((0, B_pad - B), (0, 0)))
    num_tiles = B_pad // bt

    x_c = x.astype(mm_dtype)
    w1, b1, w2, b2, wh, bh = (prep["w1"], prep["b1"], prep["w2"], prep["b2"],
                              prep["wh"], prep["bh"])

    vmem = pltpu.MemorySpace.VMEM

    def resident(arr):
        # whole array in VMEM; constant block index => stays resident across grid steps
        return pl.BlockSpec(arr.shape, lambda i: (0,) * arr.ndim, memory_space=vmem)

    latent1, latent2 = w1.shape[1], w2.shape[1]
    flops = 2 * B_pad * (state_dim * latent1 + latent1 * latent2 + latent2 * head_width)
    bytes_accessed = (x_c.size * x_c.dtype.itemsize
                      + sum(int(a.size) * a.dtype.itemsize
                            for a in (w1, b1, w2, b2, wh, bh))
                      + 2 * B_pad * n_actions * 4)

    mu, sigma = pl.pallas_call(
        actor_kernel,
        out_shape=(jax.ShapeDtypeStruct((B_pad, n_actions), jnp.float32),
                   jax.ShapeDtypeStruct((B_pad, n_actions), jnp.float32)),
        grid=(num_tiles,),
        in_specs=[
            pl.BlockSpec((bt, state_dim), lambda i: (i, 0), memory_space=vmem),
            resident(w1), resident(b1),
            resident(w2), resident(b2),
            resident(wh), resident(bh),
        ],
        out_specs=(pl.BlockSpec((bt, n_actions), lambda i: (i, 0), memory_space=vmem),
                   pl.BlockSpec((bt, n_actions), lambda i: (i, 0), memory_space=vmem)),
        compiler_params=pltpu.CompilerParams(dimension_semantics=("parallel",)),
        cost_estimate=pl.CostEstimate(flops=flops, transcendentals=0,
                                      bytes_accessed=bytes_accessed),
    )(x_c, w1, b1, w2, b2, wh, bh)

    if B_pad != B:
        mu, sigma = mu[:B], sigma[:B]          # only when batch padding was needed
    return mu, sigma


def init_params(key, state_dim, latent1, latent2, n_actions):
    """PyTorch-Linear-style uniform init; weights stored (in, out)."""
    ks = jax.random.split(key, 8)

    def linear(kw, kb, fan_in, fan_out):
        bound = 1.0 / jnp.sqrt(fan_in)
        w = jax.random.uniform(kw, (fan_in, fan_out), jnp.float32, -bound, bound)
        b = jax.random.uniform(kb, (1, fan_out), jnp.float32, -bound, bound)
        return w, b

    w1, b1 = linear(ks[0], ks[1], state_dim, latent1)
    w2, b2 = linear(ks[2], ks[3], latent1, latent2)
    wmu, bmu = linear(ks[4], ks[5], latent2, n_actions)
    wsig, bsig = linear(ks[6], ks[7], latent2, n_actions)
    return dict(w1=w1, b1=b1, w2=w2, b2=b2,
                wmu=wmu, bmu=bmu, wsig=wsig, bsig=bsig)


def _reference(x, params):
    h1 = jnp.maximum(x @ params["w1"] + params["b1"], 0.0)
    h2 = jnp.maximum(h1 @ params["w2"] + params["b2"], 0.0)
    return h2 @ params["wmu"] + params["bmu"], h2 @ params["wsig"] + params["bsig"]


if __name__ == "__main__":
    # args.state_dim = (16,), args.latent1 = 32, args.latent2 = 32, args.n_actions = 8
    STATE_DIM, LATENT1, LATENT2, N_ACTIONS = 16, 32, 32, 8

    key = jax.random.PRNGKey(0)
    k_obs, k_par, k_big = jax.random.split(key, 3)
    params = init_params(k_par, STATE_DIM, LATENT1, LATENT2, N_ACTIONS)

    # One-time parameter prep (head fusion + casts) hoisted out of the per-call path.
    prep_f32 = prepare_params(params, jnp.float32)
    prep_bf16 = prepare_params(params, jnp.bfloat16)
    jax.block_until_ready((prep_f32, prep_bf16))

    # 1) small batch (B=8), fp32 — exact check against the reference math
    obs = jax.random.normal(k_obs, (8, STATE_DIM), jnp.float32)
    mu, sigma = actor_forward(obs, prep_f32)
    jax.block_until_ready((mu, sigma))
    mu_r, sig_r = _reference(obs, params)
    assert mu.shape == (8, N_ACTIONS) and sigma.shape == (8, N_ACTIONS)
    assert jnp.allclose(mu, mu_r, atol=1e-5), "mu mismatch (fp32, B=8)"
    assert jnp.allclose(sigma, sig_r, atol=1e-5), "sigma mismatch (fp32, B=8)"

    # 2) batched path (B=512 -> bt=256, grid=(2,)), fp32 — exercises grid/megacore split
    obs_big = jax.random.normal(k_big, (512, STATE_DIM), jnp.float32)
    mu_b, sigma_b = actor_forward(obs_big, prep_f32)
    jax.block_until_ready((mu_b, sigma_b))
    mu_br, sig_br = _reference(obs_big, params)
    assert jnp.allclose(mu_b, mu_br, atol=1e-5), "mu mismatch (fp32, B=512)"
    assert jnp.allclose(sigma_b, sig_br, atol=1e-5), "sigma mismatch (fp32, B=512)"

    # 3) ragged batch (B=300 -> padded to 304, grid=(2,)), fp32 — exercises batch padding
    obs_rag = jax.random.normal(k_obs, (300, STATE_DIM), jnp.float32)
    mu_g, sigma_g = actor_forward(obs_rag, prep_f32)
    jax.block_until_ready((mu_g, sigma_g))
    mu_gr, sig_gr = _reference(obs_rag, params)
    assert jnp.allclose(mu_g, mu_gr, atol=1e-5), "mu mismatch (fp32, B=300)"
    assert jnp.allclose(sigma_g, sig_gr, atol=1e-5), "sigma mismatch (fp32, B=300)"

    # 4) bf16 matmul-input path (fp32 accumulate) — loose tolerance sanity check
    mu_h, sigma_h = actor_forward(obs_big, prep_bf16)
    jax.block_until_ready((mu_h, sigma_h))
    assert jnp.allclose(mu_h, mu_br, atol=5e-2), "mu mismatch (bf16)"
    assert jnp.allclose(sigma_h, sig_br, atol=5e-2), "sigma mismatch (bf16)"

    print("KERNEL_OK")
</pallas_src>

<mosaic_0001>
module attributes {stable_mosaic.version = 11 : i64} {
  func.func @actor_kernel(%arg0: i32, %arg1: memref<8x16xf32, #tpu.memory_space<vmem>>, %arg2: memref<16x32xf32, #tpu.memory_space<vmem>>, %arg3: memref<1x32xf32, #tpu.memory_space<vmem>>, %arg4: memref<32x32xf32, #tpu.memory_space<vmem>>, %arg5: memref<1x32xf32, #tpu.memory_space<vmem>>, %arg6: memref<32x16xf32, #tpu.memory_space<vmem>>, %arg7: memref<1x16xf32, #tpu.memory_space<vmem>>, %arg8: memref<8x8xf32, #tpu.memory_space<vmem>>, %arg9: memref<8x8xf32, #tpu.memory_space<vmem>>) attributes {dimension_semantics = [#tpu.dimension_semantics<parallel>], iteration_bounds = array<i64: 1>, scalar_prefetch = 0 : i64, scratch_operands = 0 : i64, tpu.core_type = #tpu.core_type<tc>, window_params = [{transform_indices = @transform_0, window_bounds = array<i64: 8, 16>}, {pipeline_mode = #tpu.pipeline_mode<synchronous>, transform_indices = @transform_1, window_bounds = array<i64: 16, 32>}, {pipeline_mode = #tpu.pipeline_mode<synchronous>, transform_indices = @transform_2, window_bounds = array<i64: 1, 32>}, {pipeline_mode = #tpu.pipeline_mode<synchronous>, transform_indices = @transform_3, window_bounds = array<i64: 32, 32>}, {pipeline_mode = #tpu.pipeline_mode<synchronous>, transform_indices = @transform_4, window_bounds = array<i64: 1, 32>}, {pipeline_mode = #tpu.pipeline_mode<synchronous>, transform_indices = @transform_5, window_bounds = array<i64: 32, 16>}, {pipeline_mode = #tpu.pipeline_mode<synchronous>, transform_indices = @transform_6, window_bounds = array<i64: 1, 16>}, {transform_indices = @transform_7, window_bounds = array<i64: 8, 8>}, {transform_indices = @transform_8, window_bounds = array<i64: 8, 8>}]} {
    %c0 = arith.constant 0 : index
    %c0_0 = arith.constant 0 : index
    %0 = vector.load %arg1[%c0, %c0_0] : memref<8x16xf32, #tpu.memory_space<vmem>>, vector<8x16xf32>
    %c0_1 = arith.constant 0 : index
    %c0_2 = arith.constant 0 : index
    %1 = vector.load %arg2[%c0_1, %c0_2] : memref<16x32xf32, #tpu.memory_space<vmem>>, vector<16x32xf32>
    %cst = arith.constant dense<0.000000e+00> : vector<8x32xf32>
    %2 = tpu.matmul %0, %1, %cst {dimension_numbers = #tpu.dot_dimension_numbers<[1], [0], [0], [1], [0, 0, 1, 1], [], []>} : vector<8x16xf32>, vector<16x32xf32>, vector<8x32xf32> -> vector<8x32xf32>
    %c0_3 = arith.constant 0 : index
    %c0_4 = arith.constant 0 : index
    %3 = vector.load %arg3[%c0_3, %c0_4] : memref<1x32xf32, #tpu.memory_space<vmem>>, vector<1x32xf32>
    %4 = vector.broadcast %3 : vector<1x32xf32> to vector<8x32xf32>
    %5 = arith.addf %2, %4 : vector<8x32xf32>
    %cst_5 = arith.constant 0.000000e+00 : f32
    %6 = vector.broadcast %cst_5 : f32 to vector<8x32xf32>
    %7 = arith.maximumf %5, %6 : vector<8x32xf32>
    %c0_6 = arith.constant 0 : index
    %c0_7 = arith.constant 0 : index
    %8 = vector.load %arg4[%c0_6, %c0_7] : memref<32x32xf32, #tpu.memory_space<vmem>>, vector<32x32xf32>
    %cst_8 = arith.constant dense<0.000000e+00> : vector<8x32xf32>
    %9 = tpu.matmul %7, %8, %cst_8 {dimension_numbers = #tpu.dot_dimension_numbers<[1], [0], [0], [1], [0, 0, 1, 1], [], []>} : vector<8x32xf32>, vector<32x32xf32>, vector<8x32xf32> -> vector<8x32xf32>
    %c0_9 = arith.constant 0 : index
    %c0_10 = arith.constant 0 : index
    %10 = vector.load %arg5[%c0_9, %c0_10] : memref<1x32xf32, #tpu.memory_space<vmem>>, vector<1x32xf32>
    %11 = vector.broadcast %10 : vector<1x32xf32> to vector<8x32xf32>
    %12 = arith.addf %9, %11 : vector<8x32xf32>
    %cst_11 = arith.constant 0.000000e+00 : f32
    %13 = vector.broadcast %cst_11 : f32 to vector<8x32xf32>
    %14 = arith.maximumf %12, %13 : vector<8x32xf32>
    %c0_12 = arith.constant 0 : index
    %c0_13 = arith.constant 0 : index
    %15 = vector.load %arg6[%c0_12, %c0_13] : memref<32x16xf32, #tpu.memory_space<vmem>>, vector<32x16xf32>
    %cst_14 = arith.constant dense<0.000000e+00> : vector<8x16xf32>
    %16 = tpu.matmul %14, %15, %cst_14 {dimension_numbers = #tpu.dot_dimension_numbers<[1], [0], [0], [1], [0, 0, 1, 1], [], []>} : vector<8x32xf32>, vector<32x16xf32>, vector<8x16xf32> -> vector<8x16xf32>
    %c0_15 = arith.constant 0 : index
    %c0_16 = arith.constant 0 : index
    %17 = vector.load %arg7[%c0_15, %c0_16] : memref<1x16xf32, #tpu.memory_space<vmem>>, vector<1x16xf32>
    %18 = vector.broadcast %17 : vector<1x16xf32> to vector<8x16xf32>
    %19 = arith.addf %16, %18 : vector<8x16xf32>
    %20 = vector.extract_strided_slice %19 {offsets = [0, 0], sizes = [8, 8], strides = [1, 1]} : vector<8x16xf32> to vector<8x8xf32>
    %c0_17 = arith.constant 0 : index
    %c0_18 = arith.constant 0 : index
    %21 = vector.load %arg8[%c0_17, %c0_18] : memref<8x8xf32, #tpu.memory_space<vmem>>, vector<8x8xf32>
    tpu.vector_store %arg8[%c0_17, %c0_18], %20 {strides = array<i32>} : memref<8x8xf32, #tpu.memory_space<vmem>>, vector<8x8xf32>,
    %22 = vector.extract_strided_slice %19 {offsets = [0, 8], sizes = [8, 8], strides = [1, 1]} : vector<8x16xf32> to vector<8x8xf32>
    %c0_19 = arith.constant 0 : index
    %c0_20 = arith.constant 0 : index
    %23 = vector.load %arg9[%c0_19, %c0_20] : memref<8x8xf32, #tpu.memory_space<vmem>>, vector<8x8xf32>
    tpu.vector_store %arg9[%c0_19, %c0_20], %22 {strides = array<i32>} : memref<8x8xf32, #tpu.memory_space<vmem>>, vector<8x8xf32>,
    return
  }
  func.func @transform_0(%arg0: i32) -> (i32, i32) {
    %c0_i32 = arith.constant 0 : i32
    %c0_i32_0 = arith.constant 0 : i32
    return %arg0, %c0_i32 : i32, i32
  }
  func.func @transform_1(%arg0: i32) -> (i32, i32) {
    %c0_i32 = arith.constant 0 : i32
    %c0_i32_0 = arith.constant 0 : i32
    %c0_i32_1 = arith.constant 0 : i32
    return %c0_i32, %c0_i32_0 : i32, i32
  }
  func.func @transform_2(%arg0: i32) -> (i32, i32) {
    %c0_i32 = arith.constant 0 : i32
    %c0_i32_0 = arith.constant 0 : i32
    %c0_i32_1 = arith.constant 0 : i32
    return %c0_i32, %c0_i32_0 : i32, i32
  }
  func.func @transform_3(%arg0: i32) -> (i32, i32) {
    %c0_i32 = arith.constant 0 : i32
    %c0_i32_0 = arith.constant 0 : i32
    %c0_i32_1 = arith.constant 0 : i32
    return %c0_i32, %c0_i32_0 : i32, i32
  }
  func.func @transform_4(%arg0: i32) -> (i32, i32) {
    %c0_i32 = arith.constant 0 : i32
    %c0_i32_0 = arith.constant 0 : i32
    %c0_i32_1 = arith.constant 0 : i32
    return %c0_i32, %c0_i32_0 : i32, i32
  }
  func.func @transform_5(%arg0: i32) -> (i32, i32) {
    %c0_i32 = arith.constant 0 : i32
    %c0_i32_0 = arith.constant 0 : i32
    %c0_i32_1 = arith.constant 0 : i32
    return %c0_i32, %c0_i32_0 : i32, i32
  }
  func.func @transform_6(%arg0: i32) -> (i32, i32) {
    %c0_i32 = arith.constant 0 : i32
    %c0_i32_0 = arith.constant 0 : i32
    %c0_i32_1 = arith.constant 0 : i32
    return %c0_i32, %c0_i32_0 : i32, i32
  }
  func.func @transform_7(%arg0: i32) -> (i32, i32) {
    %c0_i32 = arith.constant 0 : i32
    %c0_i32_0 = arith.constant 0 : i32
    return %arg0, %c0_i32 : i32, i32
  }
  func.func @transform_8(%arg0: i32) -> (i32, i32) {
    %c0_i32 = arith.constant 0 : i32
    %c0_i32_0 = arith.constant 0 : i32
    return %arg0, %c0_i32 : i32, i32
  }
}

</mosaic_0001>

<bundles_post_ra>
// kernel: actor_forward.1
= control target key start
LH: loop header
LB: loop body
LE: loop exit
PB: predicated region body
PF: predicated region fallthrough
CT: control target
= control target key end

     0   :  { %14 = vsyncpa [#allocation3], 0  ;;  %s607_s0 = inlined_call_operand.hbm [shape: f32[8,16], index: 0, kind: input, shape index: {}]   ;;  %s608_s1 = inlined_call_operand.vmem [shape: f32[16,32], index: 1, kind: input, shape index: {}]   ;;  %s609_s2 = inlined_call_operand.vmem [shape: f32[1,32], index: 2, kind: input, shape index: {}]   ;;  %s610_s3 = inlined_call_operand.vmem [shape: f32[32,32], index: 3, kind: input, shape index: {}]   ;;  %s611_s4 = inlined_call_operand.vmem [shape: f32[1,32], index: 4, kind: input, shape index: {}]   ;;  %s612_s5 = inlined_call_operand.vmem [shape: f32[32,16], index: 5, kind: input, shape index: {}]   ;;  %s613_s6 = inlined_call_operand.vmem [shape: f32[1,16], index: 6, kind: input, shape index: {}]   ;;  %s614_s7 = inlined_call_operand.hbm [shape: f32[8,8], index: 7, kind: output, shape index: {0}]   ;;  %s615_s8 = inlined_call_operand.hbm [shape: f32[8,8], index: 8, kind: output, shape index: {1}]  }
   0x1   :  { %15 = vsyncpa [#allocation4], 0 }
   0x2   :  { %16 = vsyncpa [#allocation7], 0  ;;  %s475_s27 = smov [#allocation2]   ;;  %s403_s9 = scalar_lea.hbm %s607_s0, 128 }
   0x3   :  { %s23_s28 = sshll.u32 %s475_s27, 4  ;;  %p404_p0 = scmp.ne.s32.totalorder %s607_s0, %s403_s9  ;;  %s24_s28 = int_to_ptr.vmem [resolvable:$true] %s23_s28 }
   0x4   :  { %p407_p1 = scmp.lt.u32.totalorder %s403_s9, %s607_s0 }
   0x6   :  { %p409_p2 = pnand %p407_p1, %p404_p0 }
   0x8   :  { %412 = shalt.err (!%p409_p2)
}
   0x9   :  { %s413_s14 = scalar_lea.vmem %s24_s28, 128  ;;  %p418_p4 = scmp.lt.s32.totalorder %s24_s28, %s24_s28 }
   0xa   :  { %p414_p3 = scmp.ne.s32.totalorder %s24_s28, %s413_s14  ;;  %p419_p5 = scmp.lt.s32.totalorder %s413_s14, %s413_s14 }
   0xc   :  { %p420_p6 = por %p419_p5, %p418_p4 }
   0xe   :  { %p421_p7 = pnand %p420_p6, %p414_p3 }
  0x10   :  { %424 = shalt.err (!%p421_p7)
}
  0x11   :  { %26 = dma.hbm_to_vmem [thread:$0]  %s607_s0, 128, %s24_s28, [#allocation3]  }
  0x12   :  { %469 = dma.done.wait [#allocation3], 128  }
  0x13   :  { %470 = vsyncadd [#allocation3], 4294967168  ;;  %v476_v0 = vmov 0.0|0.0   ;;  %vm477_vm0 = vmmov 0   ;;  %v478_v1 = vmov 0.0   ;;  %v43_v2 = vld [vmem:[%s608_s1] sm:$0xff] }
  0x14   :  { %381 = vmatprep.subr.bf16.mxu0 %v476_v0  ;;  %356 = vmatprep.mubr.msk.f32.mxu0 %vm477_vm0, %v478_v1  ;;  %v44_v3 = vld [vmem:[%s608_s1 + $0x8] sm:$0xff]  ;;  %v127_v5 = vld [vmem:[%s610_s3] sm:$0xff]  ;;  %vm52_vm1 = vcmask 130048   ;;  %v129_v9 = vld [vmem:[%s610_s3 + $0x10] sm:$0xff]  ;;  %vm138_vm2 = vcmask 261120   ;;  %s479_s17 = smov [#allocation5]  }
  0x15   :  { %384 = vmatprep.subr.bf16.mxu1 %v476_v0  ;;  %367 = vmatprep.mubr.msk.f32.mxu1 %vm477_vm0, %v478_v1  ;;  %v382_v4 = vpack.c.bf16 %v44_v3, %v43_v2  ;;  %v128_v6 = vld [vmem:[%s610_s3 + $0x8] sm:$0xff]  ;;  %v42_v8 = vld [vmem:[#allocation2] sm:$0xff]  ;;  %v130_v10 = vld [vmem:[%s610_s3 + $0x18] sm:$0xff]  ;;  %s310_s18 = sshll.u32 %s479_s17, 4  ;;  %vm297_vm3 = vcmask 64512   ;;  %s311_s18 = int_to_ptr.vmem [resolvable:$true] %s310_s18 }
  0x16   :  { %v385_v7 = vpack.c.bf16 %v128_v6, %v127_v5  ;;  %v388_v11 = vpack.c.bf16 %v130_v10, %v129_v9  ;;  %v213_v12 = vld [vmem:[%s612_s5] sm:$0xff]  ;;  %v214_v13 = vld [vmem:[%s612_s5 + $0x8] sm:$0xff]  ;;  %v215_v20 = vld [vmem:[%s612_s5 + $0x10] sm:$0xff]  ;;  %p430_p9 = scmp.lt.s32.totalorder %s311_s18, %s311_s18 }
  0x17   :  { %383 = vmatpush3.bf16.msra.mxu0 %v382_v4  ;;  %v391_v14 = vpack.c.bf16 %v214_v13, %v213_v12  ;;  %v333_v15 = vld [vmem:[%s609_s2] ss:$0 sm:$0xff]  ;;  %v216_v21 = vld [vmem:[%s612_s5 + $0x18] sm:$0xff]  ;;  %s480_s5 = smov 120  }
  0x18   :  { %386 = vmatpush3.bf16.msra.mxu1 %v385_v7  ;;  %390 = vmatprep.subr.bf16.mxu0 %v476_v0  ;;  %v394_v22 = vpack.c.bf16 %v216_v21, %v215_v20  ;;  %v335_v23 = vld [vmem:[%s611_s4] ss:$0 sm:$0xff]  ;;  %s425_s4 = scalar_lea.vmem %s311_s18, 128 }
  0x19   :  { %387 = vmatprep.subr.bf16.mxu1 %v476_v0  ;;  %v337_v28 = vld [vmem:[%s613_s6] ss:$0 sm:$0xff]  ;;  %p426_p8 = scmp.ne.s32.totalorder %s311_s18, %s425_s4  ;;  %p431_p10 = scmp.lt.s32.totalorder %s425_s4, %s425_s4 }
  0x1a   :  { %357 = vmatmul.mubr.msk.f32.vlgmr.msra.gmra.mrb[0].mxu0 %vm52_vm1, %v42_v8 }
  0x1b   :  { %378 = vmatprep.mubr.msk.f32.mxu0 %vm477_vm0, %v478_v1  ;;  %392 = vmatpush3.bf16.msra.mxu0 %v391_v14  ;;  %p432_p11 = por %p431_p10, %p430_p9 }
  0x1c   :  { %389 = vmatpush3.bf16.msra.mxu1 %v388_v11  ;;  %393 = vmatprep.subr.bf16.mxu0 %v476_v0 }
  0x1d   :  { %p433_p12 = pnand %p432_p11, %p426_p8 }
  0x1f   :  { %395 = vmatpush3.bf16.msra.mxu0 %v394_v22 }
  0xed   :  { %v122_v16 = vpop.f32.mrb[0].mxu0 }
  0xee   :  { %v123_v17 = vadd.f32 %v333_v15, %v122_v16  ;;  %v358_v18 = vpop.f32.mrb[1].mxu0 }
  0xf0   :  { %v126_v19 = vmax.f32 %v123_v17, 0.0 }
  0xf2   :  { %368 = vmatmul.mubr.msk.f32.vlgmr.msra.gmra.mrb[0].mxu1 %vm138_vm2, %v126_v19 }
 0x1c5   :  { %v208_v24 = vpop.f32.mrb[0].mxu1 }
 0x1c6   :  { %v209_v25 = vadd.f32 %v335_v23, %v208_v24  ;;  %v369_v26 = vpop.f32.mrb[1].mxu1 }
 0x1c8   :  { %v212_v27 = vmax.f32 %v209_v25, 0.0 }
 0x1ca   :  { %379 = vmatmul.mubr.msk.f32.vlgmr.msra.gmra.mrb[2].mxu0 %vm138_vm2, %v212_v27 }
 0x29d   :  { %v293_v29 = vpop.f32.mrb[2].mxu0 }
 0x29e   :  { %v294_v30 = vadd.f32 %v337_v28, %v293_v29  ;;  %v380_v31 = vpop.f32.mrb[3].mxu0 }
 0x2a0   :  { %300 = vrot.lane.b32.xlu0 %v294_v30, %s480_s5  ;;  %298 = vst.msk [vmem:[#allocation5] sm:$0xff] %vm297_vm3, %v294_v30 }
 0x2a1   :  { %436 = shalt.err (!%p433_p12)
}
 0x2a2   :  { %s437_s20 = scalar_lea.hbm %s614_s7, 128 }
 0x2a3   :  { %p438_p13 = scmp.ne.s32.totalorder %s614_s7, %s437_s20  ;;  %p441_p0 = scmp.lt.u32.totalorder %s437_s20, %s614_s7 }
 0x2a5   :  { %p443_p1 = pnand %p441_p0, %p438_p13 }
 0x2a7   :  { %446 = shalt.err (!%p443_p1)
}
 0x2a8   :  { %313 = dma.vmem_to_hbm [thread:$0]  %s311_s18, 128, %s614_s7, [#allocation4]  }
 0x2a9   :  { %s481_s25 = smov [#allocation6]  }
 0x2aa   :  { %s320_s26 = sshll.u32 %s481_s25, 4  ;;  %s321_s26 = int_to_ptr.vmem [resolvable:$true] %s320_s26 }
 0x2ab   :  { %s447_s27 = scalar_lea.vmem %s321_s26, 128  ;;  %p452_p3 = scmp.lt.s32.totalorder %s321_s26, %s321_s26 }
 0x2ac   :  { %p448_p2 = scmp.ne.s32.totalorder %s321_s26, %s447_s27  ;;  %p453_p4 = scmp.lt.s32.totalorder %s447_s27, %s447_s27 }
 0x2ae   :  { %p454_p5 = por %p453_p4, %p452_p3 }
 0x2b0   :  { %p455_p6 = pnand %p454_p5, %p448_p2 }
 0x312   :  { %v301_v32 = vpop.permute.xlu0 %300 }
 0x313   :  { %303 = vst.msk [vmem:[#allocation6] sm:$0xff] %vm297_vm3, %v301_v32 }
 0x314   :  { %458 = shalt.err (!%p455_p6)
}
 0x315   :  { %s459_s30 = scalar_lea.hbm %s615_s8, 128 }
 0x316   :  { %p460_p7 = scmp.ne.s32.totalorder %s615_s8, %s459_s30  ;;  %p463_p8 = scmp.lt.u32.totalorder %s459_s30, %s615_s8 }
 0x318   :  { %p465_p9 = pnand %p463_p8, %p460_p7 }
 0x31a   :  { %468 = shalt.err (!%p465_p9)
}
 0x31b   :  { %323 = dma.vmem_to_hbm [thread:$0]  %s321_s26, 128, %s615_s8, [#allocation7]  }
 0x31c   :  { %471 = dma.done.wait [#allocation4], 128  }
 0x31d   :  { %472 = vsyncadd [#allocation4], 4294967168 }
 0x31e   :  { %473 = dma.done.wait [#allocation7], 128  }
 0x31f   :  { %474 = vsyncadd [#allocation7], 4294967168 }
 0x320   :  { %330 = vsyncpa [#allocation3], 1 }
 0x321   :  { %331 = vsyncpa [#allocation4], 1 }
 0x322   :  { %332 = vsyncpa [#allocation7], 1 }

</bundles_post_ra>
